<compile_context>
chip_gen: v5e
topology: v5e:2x2
jax: 0.10.0
libtpu: 0.0.40
codegen_flags: <defaults>
</compile_context>

<pallas_src>
import math

import jax
import jax.numpy as jnp
from jax.experimental import pallas as pl
from jax.experimental.pallas import tpu as pltpu


# -----------------------------------------------------------------------------
# Table construction (mirrors get_sinusoid_encoding_table + the
# repeat_interleave slicing done in RoPEPositionEncoding.__init__).
# -----------------------------------------------------------------------------
def make_reference_tables(max_position: int, embedding_size: int):
    position = jnp.arange(max_position, dtype=jnp.float32)[:, None]            # [P, 1]
    div_term = jnp.exp(
        jnp.arange(0, embedding_size, 2, dtype=jnp.float32)
        * (-math.log(10000.0) / embedding_size)
    )                                                                            # [D/2]
    angles = position * div_term                                                 # [P, D/2]
    cos_position = jnp.repeat(jnp.cos(angles), 2, axis=-1)                       # [P, D]
    sin_position = jnp.repeat(jnp.sin(angles), 2, axis=-1)                       # [P, D]
    return cos_position, sin_position


def init_rope_tables(max_position: int, embedding_size: int, dtype=jnp.float32):
    """One-time init (PyTorch __init__ analogue).

    The qw2 sign pattern (-1 on even columns, +1 on odd columns) is folded into
    the sin table here, once, and both tables are stored in the activation
    dtype so table DMA / VMEM is dtype-matched to qw."""
    cos_position, sin_position = make_reference_tables(max_position, embedding_size)
    sign = jnp.where(jnp.arange(embedding_size) % 2 == 0, -1.0, 1.0).astype(jnp.float32)
    return cos_position.astype(dtype), (sin_position * sign).astype(dtype)


# -----------------------------------------------------------------------------
# Kernel: out = x * cos + swapped * sin_signed
#   swapped[..., 2k] = x[..., 2k+1], swapped[..., 2k+1] = x[..., 2k]
#   sin_signed already carries -1 on even lanes, +1 on odd lanes.
# -----------------------------------------------------------------------------
def rope_kernel(qw_ref, cos_ref, sin_ref, out_ref):
    # f32 in-register compute: works on every generation (v5e has no bf16 VALU)
    # and is free here — the kernel is HBM-bound; HBM traffic stays in qw.dtype.
    x = qw_ref[...].astype(jnp.float32)                 # (TS, LANE) or (B, TS, LANE)
    lane = x.shape[-1]
    ax = x.ndim - 1

    # Pairwise even/odd lane swap: two non-negative XLU rolls + iota parity
    # select (no parity DMA stream).  Wrap-around lanes are only ever
    # multiplied by the correctly signed/zeroed sin pattern, so no masking
    # beyond the select is needed.
    nbr_hi = pltpu.roll(x, shift=lane - 1, axis=ax)     # nbr_hi[i] = x[i+1]
    nbr_lo = pltpu.roll(x, shift=1, axis=ax)            # nbr_lo[i] = x[i-1]
    lane_id = jax.lax.broadcasted_iota(jnp.int32, x.shape, ax)
    swapped = jnp.where((lane_id & 1) == 1, nbr_lo, nbr_hi)

    cos = cos_ref[...].astype(jnp.float32)
    sin = sin_ref[...].astype(jnp.float32)
    if cos.ndim < x.ndim:                               # batch-in-block path
        cos = cos[None]                                 # broadcast tables over B
        sin = sin[None]

    out_ref[...] = (x * cos + swapped * sin).astype(out_ref.dtype)


# -----------------------------------------------------------------------------
# Wrapper
# -----------------------------------------------------------------------------
def rope_forward(qw, cos_position, sin_position, *,
                 rows_per_tile: int = 4096,
                 vmem_budget_bytes: int = 24 * 1024 * 1024,
                 batch_in_block=None,
                 donate_qw: bool = False):
    """qw: [B, S, D] -> [B, S, D] (same dtype).

    cos_position / sin_position come from init_rope_tables (sin sign-folded)."""
    B, S, D = qw.shape
    if D % 2 != 0:
        raise ValueError("RoPE requires an even embedding size.")
    if cos_position.shape[0] < S:
        raise ValueError("sequence length exceeds max_position of the tables.")

    dtype = qw.dtype
    cos = cos_position[:S].astype(dtype)                # cheap slice; tables are
    sin = sin_position[:S].astype(dtype)                # already sign-folded + cast

    # Lane-dense fold: pack positions so the last dim is a multiple of 128.
    if D % 128 == 0:
        fold = 1
    else:
        f = math.lcm(D, 128) // D
        fold = f if S % f == 0 else 1   # fallback stays correct, loses lane density
    lane = D * fold
    rows = S // fold

    qw_v = qw.reshape(B, rows, lane)
    cos_v = cos.reshape(rows, lane)
    sin_v = sin.reshape(rows, lane)

    itemsize = jnp.dtype(dtype).itemsize
    # Double-buffered working-set bytes per tile row for the two layouts.
    per_row_batched = 2 * (2 * B + 2) * lane * itemsize   # qw, out (B-wide) + cos, sin
    per_row_gridded = 2 * 4 * lane * itemsize             # qw, out, cos, sin (B squeezed)

    if batch_in_block is None:
        # Pull B into the block whenever that still leaves a large row tile:
        # B x fewer grid steps and tables read once per row tile.
        batch_in_block = (vmem_budget_bytes // per_row_batched) >= min(rows, 1024)

    per_row = per_row_batched if batch_in_block else per_row_gridded
    ts = min(rows_per_tile, max(1, vmem_budget_bytes // per_row))
    if ts >= rows:
        ts = rows                       # whole row axis in one block
    else:
        ts = max(8, (ts // 8) * 8)      # (8, 128) block-shape constraint

    grid_r = pl.cdiv(rows, ts)

    # Explicit scoped-VMEM limit (default is 16 MiB on v5e / 32 MiB on v6e+),
    # capped well under v7x's 64 MiB physical VMEM.
    vmem_limit = int(min(max(per_row * ts + (8 << 20), 32 << 20), 48 << 20))

    if batch_in_block:
        grid = (grid_r,)
        in_specs = [
            pl.BlockSpec((B, ts, lane), lambda r: (0, r, 0)),     # qw
            pl.BlockSpec((ts, lane), lambda r: (r, 0)),           # cos
            pl.BlockSpec((ts, lane), lambda r: (r, 0)),           # sin (sign-folded)
        ]
        out_specs = pl.BlockSpec((B, ts, lane), lambda r: (0, r, 0))
        dim_sem = ("parallel",)
    else:
        # B innermost so cos/sin tiles stay VMEM-resident across the batch
        # loop; marked "arbitrary" so megacore shards only the row axis.
        grid = (grid_r, B)
        in_specs = [
            pl.BlockSpec((None, ts, lane), lambda r, b: (b, r, 0)),   # qw (B squeezed)
            pl.BlockSpec((ts, lane), lambda r, b: (r, 0)),            # cos
            pl.BlockSpec((ts, lane), lambda r, b: (r, 0)),            # sin
        ]
        out_specs = pl.BlockSpec((None, ts, lane), lambda r, b: (b, r, 0))
        dim_sem = ("parallel", "arbitrary")

    extra = {}
    if donate_qw:
        extra["input_output_aliases"] = {0: 0}   # output aliases the qw buffer

    out = pl.pallas_call(
        rope_kernel,
        out_shape=jax.ShapeDtypeStruct((B, rows, lane), dtype),
        grid=grid,
        in_specs=in_specs,
        out_specs=out_specs,
        compiler_params=pltpu.CompilerParams(
            dimension_semantics=dim_sem,
            vmem_limit_bytes=vmem_limit),
        **extra,
    )(qw_v, cos_v, sin_v)

    return out.reshape(B, S, D)


# -----------------------------------------------------------------------------
# Pure-JAX reference (direct transcription of the PyTorch forward).
# -----------------------------------------------------------------------------
def rope_reference(qw, cos_position, sin_position):
    S = qw.shape[-2]
    qw2 = jnp.stack([-qw[..., 1::2], qw[..., ::2]], axis=-1).reshape(qw.shape)
    return qw * cos_position[:S] + qw2 * sin_position[:S]


if __name__ == "__main__":
    key = jax.random.PRNGKey(0)
    k1, k2 = jax.random.split(key)

    # Case 1: module-sized toy shape; D=32 exercises the lcm lane fold (lane=128)
    # and the batch-in-block path.
    max_pos1, D1, B1, S1 = 64, 32, 2, 8
    cos_raw1, sin_raw1 = make_reference_tables(max_pos1, D1)
    cos1, sin1 = init_rope_tables(max_pos1, D1, dtype=jnp.float32)
    qw1 = jax.random.normal(k1, (B1, S1, D1), dtype=jnp.float32)
    out1 = jax.block_until_ready(rope_forward(qw1, cos1, sin1))
    ref1 = rope_reference(qw1, cos_raw1, sin_raw1)
    assert out1.shape == (B1, S1, D1)
    assert jnp.allclose(out1, ref1, atol=1e-5, rtol=1e-5), "mismatch vs reference (case 1)"

    # Case 2: multi-tile grid on the unfolded (D=128) path, batch-in-block.
    max_pos2, D2, B2, S2 = 512, 128, 2, 512
    cos_raw2, sin_raw2 = make_reference_tables(max_pos2, D2)
    cos2, sin2 = init_rope_tables(max_pos2, D2, dtype=jnp.float32)
    qw2 = jax.random.normal(k2, (B2, S2, D2), dtype=jnp.float32)
    ref2 = rope_reference(qw2, cos_raw2, sin_raw2)
    out2 = jax.block_until_ready(rope_forward(qw2, cos2, sin2, rows_per_tile=128))
    assert jnp.allclose(out2, ref2, atol=1e-5, rtol=1e-5), "mismatch vs reference (case 2)"

    # Case 3: same shape, forced grid-over-batch path (B innermost, "arbitrary").
    out3 = jax.block_until_ready(
        rope_forward(qw2, cos2, sin2, rows_per_tile=128, batch_in_block=False))
    assert jnp.allclose(out3, ref2, atol=1e-5, rtol=1e-5), "mismatch vs reference (case 3)"

    # Case 4: bf16 activations with dtype-matched (bf16) tables.
    cos2_bf, sin2_bf = init_rope_tables(max_pos2, D2, dtype=jnp.bfloat16)
    qw2_bf = qw2.astype(jnp.bfloat16)
    out4 = jax.block_until_ready(rope_forward(qw2_bf, cos2_bf, sin2_bf))
    assert out4.dtype == jnp.bfloat16
    assert jnp.allclose(out4.astype(jnp.float32), ref2, atol=8e-2, rtol=8e-2), \
        "mismatch vs reference (case 4, bf16)"

    print("KERNEL_OK")
</pallas_src>

<mosaic_0001>
module attributes {stable_mosaic.version = 11 : i64} {
  func.func @rope_kernel(%arg0: i32, %arg1: memref<2x2x128xf32, #tpu.memory_space<vmem>>, %arg2: memref<2x128xf32, #tpu.memory_space<vmem>>, %arg3: memref<2x128xf32, #tpu.memory_space<vmem>>, %arg4: memref<2x2x128xf32, #tpu.memory_space<vmem>>) attributes {dimension_semantics = [#tpu.dimension_semantics<parallel>], iteration_bounds = array<i64: 1>, scalar_prefetch = 0 : i64, scratch_operands = 0 : i64, tpu.core_type = #tpu.core_type<tc>, window_params = [{transform_indices = @transform_0, window_bounds = array<i64: 2, 2, 128>}, {transform_indices = @transform_1, window_bounds = array<i64: 2, 128>}, {transform_indices = @transform_2, window_bounds = array<i64: 2, 128>}, {transform_indices = @transform_3, window_bounds = array<i64: 2, 2, 128>}]} {
    %c0 = arith.constant 0 : index
    %c0_0 = arith.constant 0 : index
    %c0_1 = arith.constant 0 : index
    %0 = vector.load %arg1[%c0, %c0_0, %c0_1] : memref<2x2x128xf32, #tpu.memory_space<vmem>>, vector<2x2x128xf32>
    %c127_i32 = arith.constant 127 : i32
    %1 = tpu.dynamic_rotate %0 by %c127_i32 dim 2 : vector<2x2x128xf32>, i32 -> vector<2x2x128xf32>
    %c1_i32 = arith.constant 1 : i32
    %2 = tpu.dynamic_rotate %0 by %c1_i32 dim 2 : vector<2x2x128xf32>, i32 -> vector<2x2x128xf32>
    %3 = tpu.iota {dimensions = array<i32: 2>} : vector<2x2x128xi32>
    %c1_i32_2 = arith.constant 1 : i32
    %4 = vector.broadcast %c1_i32_2 : i32 to vector<2x2x128xi32>
    %5 = arith.andi %3, %4 : vector<2x2x128xi32>
    %c1_i32_3 = arith.constant 1 : i32
    %6 = vector.broadcast %c1_i32_3 : i32 to vector<2x2x128xi32>
    %7 = arith.cmpi eq, %5, %6 : vector<2x2x128xi32>
    %8 = arith.select %7, %2, %1 : vector<2x2x128xi1>, vector<2x2x128xf32>
    %c0_4 = arith.constant 0 : index
    %c0_5 = arith.constant 0 : index
    %9 = vector.load %arg2[%c0_4, %c0_5] : memref<2x128xf32, #tpu.memory_space<vmem>>, vector<2x128xf32>
    %c0_6 = arith.constant 0 : index
    %c0_7 = arith.constant 0 : index
    %10 = vector.load %arg3[%c0_6, %c0_7] : memref<2x128xf32, #tpu.memory_space<vmem>>, vector<2x128xf32>
    %11 = vector.shape_cast %9 : vector<2x128xf32> to vector<1x2x128xf32>
    %12 = vector.shape_cast %10 : vector<2x128xf32> to vector<1x2x128xf32>
    %13 = vector.broadcast %11 : vector<1x2x128xf32> to vector<2x2x128xf32>
    %14 = arith.mulf %0, %13 : vector<2x2x128xf32>
    %15 = vector.broadcast %12 : vector<1x2x128xf32> to vector<2x2x128xf32>
    %16 = arith.mulf %8, %15 : vector<2x2x128xf32>
    %17 = arith.addf %14, %16 : vector<2x2x128xf32>
    %c0_8 = arith.constant 0 : index
    %c0_9 = arith.constant 0 : index
    %c0_10 = arith.constant 0 : index
    %18 = vector.load %arg4[%c0_8, %c0_9, %c0_10] : memref<2x2x128xf32, #tpu.memory_space<vmem>>, vector<2x2x128xf32>
    tpu.vector_store %arg4[%c0_8, %c0_9, %c0_10], %17 {strides = array<i32>} : memref<2x2x128xf32, #tpu.memory_space<vmem>>, vector<2x2x128xf32>,
    return
  }
  func.func @transform_0(%arg0: i32) -> (i32, i32, i32) {
    %c0_i32 = arith.constant 0 : i32
    %c0_i32_0 = arith.constant 0 : i32
    %c0_i32_1 = arith.constant 0 : i32
    return %c0_i32, %arg0, %c0_i32_0 : i32, i32, i32
  }
  func.func @transform_1(%arg0: i32) -> (i32, i32) {
    %c0_i32 = arith.constant 0 : i32
    %c0_i32_0 = arith.constant 0 : i32
    return %arg0, %c0_i32 : i32, i32
  }
  func.func @transform_2(%arg0: i32) -> (i32, i32) {
    %c0_i32 = arith.constant 0 : i32
    %c0_i32_0 = arith.constant 0 : i32
    return %arg0, %c0_i32 : i32, i32
  }
  func.func @transform_3(%arg0: i32) -> (i32, i32, i32) {
    %c0_i32 = arith.constant 0 : i32
    %c0_i32_0 = arith.constant 0 : i32
    %c0_i32_1 = arith.constant 0 : i32
    return %c0_i32, %arg0, %c0_i32_0 : i32, i32, i32
  }
}

</mosaic_0001>

<bundles_post_ra>
// kernel: tpu_custom_call.1
= control target key start
LH: loop header
LB: loop body
LE: loop exit
PB: predicated region body
PF: predicated region fallthrough
CT: control target
= control target key end

     0   :  { %8 = vsyncpa [#allocation3], 0  ;;  %s268_s0 = inlined_call_operand.hbm [shape: f32[2,2,128], index: 0, kind: input, shape index: {}]   ;;  %s269_s1 = inlined_call_operand.hbm [shape: f32[2,128], index: 1, kind: input, shape index: {}]   ;;  %s270_s2 = inlined_call_operand.hbm [shape: f32[2,128], index: 2, kind: input, shape index: {}]   ;;  %s271_s3 = inlined_call_operand.hbm [shape: f32[2,2,128], index: 3, kind: output, shape index: {}]  }
   0x1   :  { %9 = vsyncpa [#allocation6], 0  ;;  %s29_s14 = sshll.u32 %s269_s1, 4  ;;  %s30_s14 = int_to_ptr.hbm [resolvable:$true] %s29_s14 }
   0x2   :  { %10 = vsyncpa [#allocation4], 0  ;;  %s214_s15 = smov [#allocation5]   ;;  %s15_s19 = sshll.u32 %s268_s0, 4  ;;  %s16_s19 = int_to_ptr.hbm [resolvable:$true] %s15_s19 }
   0x3   :  { %s31_s16 = sshll.u32 %s214_s15, 4  ;;  %s215_s20 = smov [#allocation2]   ;;  %s32_s16 = int_to_ptr.vmem [resolvable:$true] %s31_s16 }
   0x4   :  { %34 = dma.hbm_to_vmem [thread:$0]  %s30_s14, 32, %s32_s16, [#allocation6]  }
   0x5   :  { %s17_s21 = sshll.u32 %s215_s20, 4  ;;  %s216_s22 = smov 32   ;;  %s18_s21 = int_to_ptr.vmem [resolvable:$true] %s17_s21 }
   0x6   :  { %s217_s23 = smov 2   ;;  %s40_s25 = sshll.u32 %s270_s2, 4  ;;  %s41_s25 = int_to_ptr.hbm [resolvable:$true] %s40_s25 }
   0x7   :  { %23 = dma.hbm_to_vmem [thread:$0]  %s16_s19, 64, %s18_s21, [#allocation3], %s216_s22, %s216_s22, %s217_s23  }
   0x8   :  { %s218_s26 = smov [#allocation7]  }
   0x9   :  { %s42_s27 = sshll.u32 %s218_s26, 4  ;;  %s43_s27 = int_to_ptr.vmem [resolvable:$true] %s42_s27 }
   0xa   :  { %45 = dma.hbm_to_vmem [thread:$0]  %s41_s25, 32, %s43_s27, [#allocation6]  }
   0xb   :  { %208 = dma.done.wait [#allocation3], 64  }
   0xc   :  { %209 = vsyncadd [#allocation3], 4294967232 }
   0xd   :  { %210 = dma.done.wait [#allocation6], 64  }
   0xe   :  { %211 = vsyncadd [#allocation6], 4294967232  ;;  %v58_v0 = vld [vmem:[#allocation2] sm:$0x3]  ;;  %s219_s0 = smov 1   ;;  %s220_s28 = smov 127   ;;  %v68_v2 = vlaneseq }
   0xf   :  { %64 = vrot.lane.b32.xlu1 %v58_v0, %s219_s0  ;;  %60 = vrot.lane.b32.xlu0 %v58_v0, %s220_s28  ;;  %v59_v1 = vld [vmem:[#allocation2 + $0x2] sm:$0x3]  ;;  %v74_v5 = vld [vmem:[#allocation5] sm:$0x3]  ;;  %v75_v7 = vld [vmem:[#allocation7] sm:$0x3] }
  0x10   :  { %v69_v3 = vand.u32 127, %v68_v2  ;;  %v76_v8 = vmul.f32 %v74_v5, %v58_v0  ;;  %v77_v14 = vmul.f32 %v74_v5, %v59_v1  ;;  %s221_s2 = smov [#allocation8]   ;;  %s90_s5 = sshll.u32 %s271_s3, 4  ;;  %s91_s5 = int_to_ptr.hbm [resolvable:$true] %s90_s5 }
  0x11   :  { %s88_s29 = sshll.u32 %s221_s2, 4  ;;  %s89_s29 = int_to_ptr.vmem [resolvable:$true] %s88_s29 }
  0x12   :  { %v70_v4 = vand.u32 1, %v69_v3 }
  0x14   :  { %vm254_vm0 = vcmp.eq.s32.totalorder %v70_v4, 1 }
  0x17   :  { %66 = vrot.lane.b32.xlu1 %v59_v1, %s219_s0  ;;  %62 = vrot.lane.b32.xlu0 %v59_v1, %s220_s28 }
  0x81   :  { %v65_v9 = vpop.permute.xlu1 %64  ;;  %v61_v10 = vpop.permute.xlu0 %60 }
  0x82   :  { %v72_v11 = vsel %vm254_vm0, %v65_v9, %v61_v10 }
  0x83   :  { %v78_v12 = vmul.f32 %v75_v7, %v72_v11 }
  0x85   :  { %v80_v13 = vadd.f32 %v78_v12, %v76_v8 }
  0x87   :  { %82 = vst [vmem:[#allocation8] sm:$0x3] %v80_v13 }
  0x89   :  { %v67_v15 = vpop.permute.xlu1 %66  ;;  %v63_v16 = vpop.permute.xlu0 %62 }
  0x8a   :  { %v73_v17 = vsel %vm254_vm0, %v67_v15, %v63_v16 }
  0x8b   :  { %v79_v18 = vmul.f32 %v75_v7, %v73_v17 }
  0x8d   :  { %v81_v19 = vadd.f32 %v79_v18, %v77_v14 }
  0x8f   :  { %83 = vst [vmem:[#allocation8 + $0x2] sm:$0x3] %v81_v19 }
  0x90   :  { %96 = dma.vmem_to_hbm [thread:$0]  %s89_s29, 64, %s91_s5, [#allocation4], %s216_s22, %s216_s22, %s217_s23  }
  0x91   :  { %212 = dma.done.wait [#allocation4], 64  }
  0x92   :  { %213 = vsyncadd [#allocation4], 4294967232 }
  0x93   :  { %101 = vsyncpa [#allocation3], 1 }
  0x94   :  { %102 = vsyncpa [#allocation6], 1 }
  0x95   :  { %103 = vsyncpa [#allocation4], 1 }

</bundles_post_ra>
